<compile_context>
chip_gen: v7x
topology: tpu7x:2x2x1
jax: 0.10.0
libtpu: 0.0.40
codegen_flags: <defaults>
</compile_context>

<pallas_src>
import functools
from collections import namedtuple

import numpy as np
import jax
import jax.numpy as jnp
from jax import lax
from jax.experimental import pallas as pl
from jax.experimental.pallas import tpu as pltpu

MDNParams = namedtuple(
    "MDNParams", ["mu1", "mu2", "log_sigma1", "log_sigma2", "rho", "pi_logit"]
)

_LANE = 128


# ----------------------------------------------------------------------------
# Generic single-block linear kernel: (N, K) @ (K, M) + b   (bf16 MXU, f32 acc)
# Used for the hoisted per-layer input projections.
# ----------------------------------------------------------------------------
def _linear_kernel(x_ref, w_ref, b_ref, o_ref):
    x = x_ref[...].astype(jnp.bfloat16)
    o_ref[...] = (
        jnp.dot(x, w_ref[...], preferred_element_type=jnp.float32) + b_ref[...]
    )


def linear(x, w_t_bf16, b):
    """x: (N, K) f32, w_t_bf16: (K, M) bf16, b: (1, M) f32 -> (N, M) f32."""
    N, K = x.shape
    M = w_t_bf16.shape[-1]
    return pl.pallas_call(
        _linear_kernel,
        out_shape=jax.ShapeDtypeStruct((N, M), jnp.float32),
        grid=(1,),
        in_specs=[
            pl.BlockSpec((N, K), lambda i: (0, 0)),
            pl.BlockSpec((K, M), lambda i: (0, 0)),
            pl.BlockSpec((1, M), lambda i: (0, 0)),
        ],
        out_specs=pl.BlockSpec((N, M), lambda i: (0, 0)),
        compiler_params=pltpu.CompilerParams(dimension_semantics=("arbitrary",)),
    )(x, w_t_bf16, b)


# ----------------------------------------------------------------------------
# LSTM recurrence kernel (non-final layers): grid=(1,), in-kernel time loop.
# xproj already contains x @ W_ih^T + (b_ih + b_hh).
# ----------------------------------------------------------------------------
def _lstm_recurrence_kernel(xproj_ref, whh_ref, h0_ref, c0_ref,
                            out_ref, hn_ref, cn_ref, *, unroll):
    T = xproj_ref.shape[0]
    H = h0_ref.shape[-1]
    whh = whh_ref[...]                         # (H, 4H) bf16, hoisted out of loop

    def step(t, carry):
        h, c = carry
        gates = xproj_ref[t] + jnp.dot(
            h.astype(jnp.bfloat16), whh, preferred_element_type=jnp.float32
        )                                      # (B, 4H) f32
        # PyTorch gate order along the 4H axis: [i, f, g, o]
        # TODO(synk): for realistic H (>=128) pad H to a lane multiple so these
        # four gate slices are lane-aligned (keeps them off the XLU path).
        i_g = jax.nn.sigmoid(gates[:, 0 * H:1 * H])
        f_g = jax.nn.sigmoid(gates[:, 1 * H:2 * H])
        g_g = jnp.tanh(gates[:, 2 * H:3 * H])
        o_g = jax.nn.sigmoid(gates[:, 3 * H:4 * H])
        c_new = f_g * c + i_g * g_g
        h_new = o_g * jnp.tanh(c_new)
        out_ref[t] = h_new
        return (h_new, c_new)

    h_fin, c_fin = lax.fori_loop(0, T, step, (h0_ref[...], c0_ref[...]),
                                 unroll=unroll)
    hn_ref[...] = h_fin
    cn_ref[...] = c_fin


def lstm_recurrence(xproj, whh_t_bf16, h0, c0, *, unroll):
    """xproj: (T, B, 4H) f32. Returns (out (T,B,H), hn (B,H), cn (B,H))."""
    T, B, G = xproj.shape
    H = h0.shape[-1]
    kernel = functools.partial(_lstm_recurrence_kernel, unroll=unroll)
    return pl.pallas_call(
        kernel,
        out_shape=(
            jax.ShapeDtypeStruct((T, B, H), jnp.float32),
            jax.ShapeDtypeStruct((B, H), jnp.float32),
            jax.ShapeDtypeStruct((B, H), jnp.float32),
        ),
        grid=(1,),
        in_specs=[
            pl.BlockSpec((T, B, G), lambda i: (0, 0, 0)),
            pl.BlockSpec((H, G), lambda i: (0, 0)),
            pl.BlockSpec((B, H), lambda i: (0, 0)),
            pl.BlockSpec((B, H), lambda i: (0, 0)),
        ],
        out_specs=[
            pl.BlockSpec((T, B, H), lambda i: (0, 0, 0)),
            pl.BlockSpec((B, H), lambda i: (0, 0)),
            pl.BlockSpec((B, H), lambda i: (0, 0)),
        ],
        compiler_params=pltpu.CompilerParams(dimension_semantics=("arbitrary",)),
    )(xproj, whh_t_bf16, h0, c0)


# ----------------------------------------------------------------------------
# Final layer: LSTM recurrence with the MDN linear fused in.  Emits only the
# lane-padded MDN output (T, B, O_pad) plus final h/c; the last layer's hidden
# activations never leave VMEM.
# ----------------------------------------------------------------------------
def _lstm_mdn_kernel(xproj_ref, whh_ref, wm_ref, bm_ref, h0_ref, c0_ref,
                     mdn_ref, hn_ref, cn_ref, *, unroll):
    T = xproj_ref.shape[0]
    B, H = h0_ref.shape
    Opad = wm_ref.shape[-1]
    whh = whh_ref[...]                                     # (H, 4H) bf16
    wm = wm_ref[...]                                       # (H, Opad) bf16
    bm = jnp.broadcast_to(bm_ref[...], (B, Opad))          # hoisted broadcast

    def step(t, carry):
        h, c = carry
        gates = xproj_ref[t] + jnp.dot(
            h.astype(jnp.bfloat16), whh, preferred_element_type=jnp.float32
        )
        i_g = jax.nn.sigmoid(gates[:, 0 * H:1 * H])
        f_g = jax.nn.sigmoid(gates[:, 1 * H:2 * H])
        g_g = jnp.tanh(gates[:, 2 * H:3 * H])
        o_g = jax.nn.sigmoid(gates[:, 3 * H:4 * H])
        c_new = f_g * c + i_g * g_g
        h_new = o_g * jnp.tanh(c_new)
        # Fused MDN head on the still-in-VMEM hidden state; 128-lane output.
        mdn_ref[t] = jnp.dot(
            h_new.astype(jnp.bfloat16), wm, preferred_element_type=jnp.float32
        ) + bm
        return (h_new, c_new)

    h_fin, c_fin = lax.fori_loop(0, T, step, (h0_ref[...], c0_ref[...]),
                                 unroll=unroll)
    hn_ref[...] = h_fin
    cn_ref[...] = c_fin


def lstm_mdn_fused(xproj, whh_t_bf16, wm_t_pad_bf16, bm_pad, h0, c0, *, unroll):
    T, B, G = xproj.shape
    H = h0.shape[-1]
    Opad = wm_t_pad_bf16.shape[-1]
    kernel = functools.partial(_lstm_mdn_kernel, unroll=unroll)
    return pl.pallas_call(
        kernel,
        out_shape=(
            jax.ShapeDtypeStruct((T, B, Opad), jnp.float32),
            jax.ShapeDtypeStruct((B, H), jnp.float32),
            jax.ShapeDtypeStruct((B, H), jnp.float32),
        ),
        grid=(1,),
        in_specs=[
            pl.BlockSpec((T, B, G), lambda i: (0, 0, 0)),
            pl.BlockSpec((H, G), lambda i: (0, 0)),
            pl.BlockSpec((H, Opad), lambda i: (0, 0)),
            pl.BlockSpec((1, Opad), lambda i: (0, 0)),
            pl.BlockSpec((B, H), lambda i: (0, 0)),
            pl.BlockSpec((B, H), lambda i: (0, 0)),
        ],
        out_specs=[
            pl.BlockSpec((T, B, Opad), lambda i: (0, 0, 0)),
            pl.BlockSpec((B, H), lambda i: (0, 0)),
            pl.BlockSpec((B, H), lambda i: (0, 0)),
        ],
        compiler_params=pltpu.CompilerParams(dimension_semantics=("arbitrary",)),
    )(xproj, whh_t_bf16, wm_t_pad_bf16, bm_pad, h0, c0)


# ----------------------------------------------------------------------------
# Full HandwritingRNN forward (layer_type='lstm', eval mode)
# ----------------------------------------------------------------------------
def handwriting_rnn_forward(x, hidden, params, n_gaussian):
    """x: (B, T, input_dim) batch_first; hidden = (h0, c0), each (L, B, H)."""
    # TODO(synk): recurrent_dropout only applies between layers in train() mode;
    # this implements the eval forward (dropout is a no-op). 'gru' not implemented.
    h0_all, c0_all = hidden
    B, T, _ = x.shape
    H = h0_all.shape[-1]
    num_layers = len(params["lstm"])
    unroll = T <= 32   # small static T: fully unroll the in-kernel time loop

    x_tbd = jnp.transpose(x, (1, 0, 2)).astype(jnp.float32)   # time-major (T,B,D)
    cur_flat = x_tbd.reshape(T * B, -1)

    hn_list, cn_list = [], []
    mdn_tb = None
    for l, lp in enumerate(params["lstm"]):
        # Hoisted input projection: one GEMM over all T*B rows (bias folded in).
        xproj = linear(cur_flat, lp["wih_t"], lp["b"]).reshape(T, B, 4 * H)
        if l < num_layers - 1:
            out, hn, cn = lstm_recurrence(
                xproj, lp["whh_t"], h0_all[l], c0_all[l], unroll=unroll)
            cur_flat = out.reshape(T * B, H)
        else:
            mdn_tb, hn, cn = lstm_mdn_fused(
                xproj, lp["whh_t"], params["mdn"]["w_t_pad"],
                params["mdn"]["b_pad"], h0_all[l], c0_all[l], unroll=unroll)
        hn_list.append(hn)
        cn_list.append(cn)

    # Only the small, lane-padded MDN output is transposed back to batch_first
    # (matches out.contiguous().view(-1, H) row order), then sliced to O.
    O = params["mdn"]["out_dim"]
    mdn_out = jnp.transpose(mdn_tb, (1, 0, 2)).reshape(B * T, -1)[:, :O]

    n = n_gaussian
    mu1 = mdn_out[:, 0 * n:1 * n]
    mu2 = mdn_out[:, 1 * n:2 * n]
    log_sigma1 = mdn_out[:, 2 * n:3 * n]
    log_sigma2 = mdn_out[:, 3 * n:4 * n]
    rho = mdn_out[:, 4 * n:5 * n]
    pi_logit = mdn_out[:, 5 * n:6 * n]
    e_logit = mdn_out[:, 6 * n:]

    mdnparams = MDNParams(mu1=mu1, mu2=mu2, log_sigma1=log_sigma1,
                          log_sigma2=log_sigma2, rho=jnp.tanh(rho),
                          pi_logit=pi_logit)
    hn = jnp.stack(hn_list, axis=0)
    cn = jnp.stack(cn_list, axis=0)
    return mdnparams, e_logit, (hn, cn)


def build_kernel_params(ref_params):
    """Cast weights to bf16 (MXU operands) and lane-pad the MDN head to 128."""
    lstm = []
    for lp in ref_params["lstm"]:
        lstm.append({
            "wih_t": lp["wih_t"].astype(jnp.bfloat16),      # (D, 4H)
            "whh_t": lp["whh_t"].astype(jnp.bfloat16),      # (H, 4H)
            "b": lp["b"].astype(jnp.float32),               # (1, 4H) = b_ih + b_hh
        })
    w_t = ref_params["mdn"]["w_t"]                          # (H, O)
    b = ref_params["mdn"]["b"]                              # (1, O)
    O = w_t.shape[-1]
    Opad = ((O + _LANE - 1) // _LANE) * _LANE
    w_t_pad = jnp.pad(w_t, ((0, 0), (0, Opad - O))).astype(jnp.bfloat16)
    b_pad = jnp.pad(b, ((0, 0), (0, Opad - O))).astype(jnp.float32)
    return {"lstm": lstm,
            "mdn": {"w_t_pad": w_t_pad, "b_pad": b_pad, "out_dim": O}}


# ----------------------------------------------------------------------------
# Pure-JAX f32 reference (mirrors nn.LSTM + nn.Linear semantics).
# ----------------------------------------------------------------------------
def reference_forward(x, hidden, params, n_gaussian):
    h0_all, c0_all = hidden
    cur = jnp.transpose(x, (1, 0, 2)).astype(jnp.float32)     # (T, B, D)
    hn_list, cn_list = [], []
    for l, lp in enumerate(params["lstm"]):
        wih_t, whh_t, b = lp["wih_t"], lp["whh_t"], lp["b"][0]

        def step(carry, xt, wih_t=wih_t, whh_t=whh_t, b=b):
            h, c = carry
            gates = xt @ wih_t + h @ whh_t + b
            i, f, g, o = jnp.split(gates, 4, axis=-1)
            i, f, o = jax.nn.sigmoid(i), jax.nn.sigmoid(f), jax.nn.sigmoid(o)
            g = jnp.tanh(g)
            c = f * c + i * g
            h = o * jnp.tanh(c)
            return (h, c), h

        (hT, cT), ys = jax.lax.scan(step, (h0_all[l], c0_all[l]), cur)
        hn_list.append(hT)
        cn_list.append(cT)
        cur = ys
    out_bth = jnp.transpose(cur, (1, 0, 2))
    B, T, H = out_bth.shape
    flat = out_bth.reshape(B * T, H)
    mdn_out = flat @ params["mdn"]["w_t"] + params["mdn"]["b"][0]
    n = n_gaussian
    parts = [mdn_out[:, i * n:(i + 1) * n] for i in range(6)] + [mdn_out[:, 6 * n:]]
    mdnparams = MDNParams(parts[0], parts[1], parts[2], parts[3],
                          jnp.tanh(parts[4]), parts[5])
    return mdnparams, parts[6], (jnp.stack(hn_list), jnp.stack(cn_list))


if __name__ == "__main__":
    # Module hyperparameters (small, consistent with the PyTorch module)
    input_dim = 3          # handwriting strokes: (dx, dy, pen)
    hidden_dim = 32
    n_gaussian = 4
    output_dim = 6 * n_gaussian + 1   # -> e_logit has width 1
    num_layers = 2
    batch = 2
    seq_len = 8

    key = jax.random.PRNGKey(0)
    keys = jax.random.split(key, 4 * num_layers + 6)
    k_iter = iter(keys)
    kscale = 1.0 / np.sqrt(hidden_dim)

    # Deterministic synthetic parameters (PyTorch-style uniform init), in f32.
    lstm_f32, d_in = [], input_dim
    for _ in range(num_layers):
        w_ih = jax.random.uniform(next(k_iter), (4 * hidden_dim, d_in),
                                  jnp.float32, -kscale, kscale)
        w_hh = jax.random.uniform(next(k_iter), (4 * hidden_dim, hidden_dim),
                                  jnp.float32, -kscale, kscale)
        b_ih = jax.random.uniform(next(k_iter), (4 * hidden_dim,),
                                  jnp.float32, -kscale, kscale)
        b_hh = jax.random.uniform(next(k_iter), (4 * hidden_dim,),
                                  jnp.float32, -kscale, kscale)
        lstm_f32.append({"wih_t": w_ih.T,                      # (D, 4H)
                         "whh_t": w_hh.T,                      # (H, 4H)
                         "b": (b_ih + b_hh)[None, :]})         # (1, 4H)
        d_in = hidden_dim
    w_mdn = jax.random.uniform(next(k_iter), (output_dim, hidden_dim),
                               jnp.float32, -kscale, kscale)
    b_mdn = jax.random.uniform(next(k_iter), (output_dim,),
                               jnp.float32, -kscale, kscale)
    ref_params = {"lstm": lstm_f32,
                  "mdn": {"w_t": w_mdn.T, "b": b_mdn[None, :]}}

    # Kernel params: bf16 MXU weights + lane-padded MDN head.
    params = build_kernel_params(ref_params)

    # Inputs: batch_first (B, T, input_dim); nonzero hidden to exercise h0/c0.
    x = jax.random.normal(next(k_iter), (batch, seq_len, input_dim), jnp.float32)
    h0 = 0.1 * jax.random.normal(next(k_iter), (num_layers, batch, hidden_dim),
                                 jnp.float32)
    c0 = 0.1 * jax.random.normal(next(k_iter), (num_layers, batch, hidden_dim),
                                 jnp.float32)

    mdnparams, e_logit, (hn, cn) = handwriting_rnn_forward(
        x, (h0, c0), params, n_gaussian)
    jax.block_until_ready((mdnparams, e_logit, hn, cn))

    # Verify against the pure-JAX f32 reference (bf16 MXU operands -> looser tol).
    ref_mdn, ref_e, (ref_hn, ref_cn) = reference_forward(
        x, (h0, c0), ref_params, n_gaussian)
    atol = rtol = 3e-2
    for a, b in zip(mdnparams, ref_mdn):
        np.testing.assert_allclose(np.asarray(a), np.asarray(b), atol=atol, rtol=rtol)
    np.testing.assert_allclose(np.asarray(e_logit), np.asarray(ref_e),
                               atol=atol, rtol=rtol)
    np.testing.assert_allclose(np.asarray(hn), np.asarray(ref_hn),
                               atol=atol, rtol=rtol)
    np.testing.assert_allclose(np.asarray(cn), np.asarray(ref_cn),
                               atol=atol, rtol=rtol)

    assert e_logit.shape == (batch * seq_len, 1)
    assert mdnparams.mu1.shape == (batch * seq_len, n_gaussian)
    print("KERNEL_OK")
</pallas_src>

<mosaic_0001>
module attributes {stable_mosaic.version = 11 : i64} {
  func.func @_linear_kernel(%arg0: i32, %arg1: memref<16x3xf32, #tpu.memory_space<vmem>>, %arg2: memref<3x128xbf16, #tpu.memory_space<vmem>>, %arg3: memref<1x128xf32, #tpu.memory_space<vmem>>, %arg4: memref<16x128xf32, #tpu.memory_space<vmem>>) attributes {dimension_semantics = [#tpu.dimension_semantics<arbitrary>], iteration_bounds = array<i64: 1>, scalar_prefetch = 0 : i64, scratch_operands = 0 : i64, tpu.core_type = #tpu.core_type<tc>, window_params = [{pipeline_mode = #tpu.pipeline_mode<synchronous>, transform_indices = @transform_0, window_bounds = array<i64: 16, 3>}, {pipeline_mode = #tpu.pipeline_mode<synchronous>, transform_indices = @transform_1, window_bounds = array<i64: 3, 128>}, {pipeline_mode = #tpu.pipeline_mode<synchronous>, transform_indices = @transform_2, window_bounds = array<i64: 1, 128>}, {pipeline_mode = #tpu.pipeline_mode<synchronous>, transform_indices = @transform_3, window_bounds = array<i64: 16, 128>}]} {
    %c0 = arith.constant 0 : index
    %c0_0 = arith.constant 0 : index
    %0 = vector.load %arg1[%c0, %c0_0] : memref<16x3xf32, #tpu.memory_space<vmem>>, vector<16x3xf32>
    %1 = arith.truncf %0 : vector<16x3xf32> to vector<16x3xbf16>
    %c0_1 = arith.constant 0 : index
    %c0_2 = arith.constant 0 : index
    %2 = vector.load %arg2[%c0_1, %c0_2] : memref<3x128xbf16, #tpu.memory_space<vmem>>, vector<3x128xbf16>
    %cst = arith.constant dense<0.000000e+00> : vector<16x128xf32>
    %3 = tpu.matmul %1, %2, %cst {dimension_numbers = #tpu.dot_dimension_numbers<[1], [0], [0], [1], [0, 0, 1, 1], [], []>} : vector<16x3xbf16>, vector<3x128xbf16>, vector<16x128xf32> -> vector<16x128xf32>
    %c0_3 = arith.constant 0 : index
    %c0_4 = arith.constant 0 : index
    %4 = vector.load %arg3[%c0_3, %c0_4] : memref<1x128xf32, #tpu.memory_space<vmem>>, vector<1x128xf32>
    %5 = vector.broadcast %4 : vector<1x128xf32> to vector<16x128xf32>
    %6 = arith.addf %3, %5 : vector<16x128xf32>
    %c0_5 = arith.constant 0 : index
    %c0_6 = arith.constant 0 : index
    %7 = vector.load %arg4[%c0_5, %c0_6] : memref<16x128xf32, #tpu.memory_space<vmem>>, vector<16x128xf32>
    tpu.vector_store %arg4[%c0_5, %c0_6], %6 {strides = array<i32>} : memref<16x128xf32, #tpu.memory_space<vmem>>, vector<16x128xf32>,
    return
  }
  func.func @transform_0(%arg0: i32) -> (i32, i32) {
    %c0_i32 = arith.constant 0 : i32
    %c0_i32_0 = arith.constant 0 : i32
    %c0_i32_1 = arith.constant 0 : i32
    return %c0_i32, %c0_i32_0 : i32, i32
  }
  func.func @transform_1(%arg0: i32) -> (i32, i32) {
    %c0_i32 = arith.constant 0 : i32
    %c0_i32_0 = arith.constant 0 : i32
    %c0_i32_1 = arith.constant 0 : i32
    return %c0_i32, %c0_i32_0 : i32, i32
  }
  func.func @transform_2(%arg0: i32) -> (i32, i32) {
    %c0_i32 = arith.constant 0 : i32
    %c0_i32_0 = arith.constant 0 : i32
    %c0_i32_1 = arith.constant 0 : i32
    return %c0_i32, %c0_i32_0 : i32, i32
  }
  func.func @transform_3(%arg0: i32) -> (i32, i32) {
    %c0_i32 = arith.constant 0 : i32
    %c0_i32_0 = arith.constant 0 : i32
    %c0_i32_1 = arith.constant 0 : i32
    return %c0_i32, %c0_i32_0 : i32, i32
  }
}

</mosaic_0001>

<bundles_post_ra>
// kernel: tpu_custom_call.1
= control target key start
LH: loop header
LB: loop body
LE: loop exit
PB: predicated region body
PF: predicated region fallthrough
CT: control target
= control target key end

     0   :  { %vm31_vm0 = vcmask 1040384   ;;  %vm32_vm1 = vcmask 1041408   ;;  %v137_v1 = vmov 0.0   ;;  %v138_v2 = vmov 65535   ;;  %s187_s0 = inlined_call_operand.vmem [shape: f32[16,3], index: 0, kind: input, shape index: {}]   ;;  %s188_s1 = inlined_call_operand.vmem [shape: bf16[3,128], index: 1, kind: input, shape index: {}]   ;;  %s189_s2 = inlined_call_operand.vmem [shape: f32[1,128], index: 2, kind: input, shape index: {}]   ;;  %s190_s3 = inlined_call_operand.hbm [shape: f32[16,128], index: 3, kind: output, shape index: {}]  }
   0x1   :  { %v19_v0 = vld [vmem:[%s188_s1] sm:$0x3]  ;;  %101 = vmatprep.subr.bf16.mxu0 %v137_v1  ;;  %v33_v3 = vsel %vm31_vm0, 4294967295, %v138_v2  ;;  %v17_v5 = vld [vmem:[%s187_s0 + $0x8] sm:$0xff]  ;;  %vm139_vm2 = vmmov 0  }
   0x2   :  { %v16_v4 = vld [vmem:[%s187_s0] sm:$0xff]  ;;  %v34_v6 = vsel %vm32_vm1, %v33_v3, 0  ;;  %103 = vmatprep.mubr.msk.bf16.mxu0 %vm139_vm2, %v137_v1 }
   0x3   :  { %8 = vsyncpa [#allocation3], 0  ;;  %v36_v7 = vand.u32 %v34_v6, %v19_v0  ;;  %v18_v8 = vpack.c.bf16 %v17_v5, %v16_v4  ;;  %vm27_vm3 = vcmask 23552   ;;  %v97_v9 = vld [vmem:[%s189_s2] ss:$0 sm:$0xff]  ;;  %s140_s19 = smov [#allocation2]  }
   0x4   :  { %s86_s20 = sshll.u32 %s140_s19, 4  ;;  %s87_s20 = int_to_ptr.vmem [resolvable:$true] %s86_s20 }
   0x5   :  { %102 = vmatpush3.bf16.msra.mxu0 %v36_v7  ;;  %s113_s0 = scalar_lea.vmem %s87_s20, 256  ;;  %p118_p1 = scmp.lt.s32.totalorder %s87_s20, %s87_s20 }
   0x6   :  { %p114_p0 = scmp.ne.s32.totalorder %s87_s20, %s113_s0  ;;  %p119_p2 = scmp.lt.s32.totalorder %s113_s0, %s113_s0 }
   0x8   :  { %104 = vmatmul.mubr.msk.bf16.vlgmr.msra.gmra.mrb[0].mxu0 %vm27_vm3, %v18_v8  ;;  %p120_p3 = por %p119_p2, %p118_p1 }
   0xa   :  { %p121_p4 = pnand %p120_p3, %p114_p0 }
  0xdb   :  { %v72_v10 = vpop.f32.mrb[0].mxu0 }
  0xdc   :  { %v73_v11 = vadd.f32 %v97_v9, %v72_v10  ;;  %v105_v12 = vpop.f32.mrb[1].mxu0 }
  0xdd   :  { %v75_v13 = vpop.f32.mrb[2].mxu0 }
  0xde   :  { %79 = vst [vmem:[#allocation2] sm:$0xff] %v73_v11  ;;  %v76_v14 = vadd.f32 %v97_v9, %v75_v13  ;;  %v106_v15 = vpop.f32.mrb[3].mxu0 }
  0xe0   :  { %80 = vst [vmem:[#allocation2 + $0x8] sm:$0xff] %v76_v14 }
  0xe1   :  { %124 = shalt.err (!%p121_p4)
}
  0xe2   :  { %s125_s22 = scalar_lea.hbm %s190_s3, 256 }
  0xe3   :  { %p126_p5 = scmp.ne.s32.totalorder %s190_s3, %s125_s22  ;;  %p129_p6 = scmp.lt.u32.totalorder %s125_s22, %s190_s3 }
  0xe5   :  { %p131_p7 = pnand %p129_p6, %p126_p5 }
  0xe7   :  { %134 = shalt.err (!%p131_p7)
}
  0xe8   :  { %s141_s27 = smov 128   ;;  %s142_s28 = smov 8  }
  0xe9   :  { %92 = dma.vmem_to_hbm [thread:$0]  %s87_s20, 256, %s190_s3, [#allocation3], %s141_s27, %s141_s27, %s142_s28  }
  0xea   :  { %135 = dma.done.wait [#allocation3], 256  }
  0xeb   :  { %136 = vsyncadd [#allocation3], 4294967040 }
  0xec   :  { %96 = vsyncpa [#allocation3], 1 }

</bundles_post_ra>
